<compile_context>
chip_gen: v7x
topology: tpu7x:2x2x1
jax: 0.10.0
libtpu: 0.0.40
codegen_flags: <defaults>
</compile_context>

<pallas_src>
import functools

import jax
import jax.numpy as jnp
from jax import lax
from jax.experimental import pallas as pl
from jax.experimental.pallas import tpu as pltpu

EPS = 1e-5  # torch.nn.LayerNorm default eps
_SQRT_2_OVER_PI = 0.7978845608028654


def _round_up(x, m):
    return ((x + m - 1) // m) * m


def _gelu_tanh(h):
    # TODO(synk): PyTorch nn.GELU() default is the exact erf form; the tanh
    # approximation is used here for a guaranteed TPU-native (EUP) lowering.
    return 0.5 * h * (1.0 + jnp.tanh(_SQRT_2_OVER_PI * (h + 0.044715 * h * h * h)))


def _prenorm_ffn_kernel(x_ref, w1_ref, b1_ref, w2_ref, b2_ref, o_ref, *, sub):
    """Fused LayerNorm (affine pre-folded into w1/b1) + Linear-GELU-Linear.

    Works through the (tile, C) block in `sub`-row chunks so the (sub, 4C)
    f32 intermediates stay small while the HBM<->VMEM DMA tile stays large.
    """
    w1 = w1_ref[...]                       # (C, H) bf16, LN gamma folded in
    b1 = b1_ref[...]                       # (1, H) f32,  LN beta folded in
    w2 = w2_ref[...]                       # (H, C) bf16
    b2 = b2_ref[...]                       # (1, C) f32
    n_sub = x_ref.shape[0] // sub
    inv_c = 1.0 / x_ref.shape[1]

    def body(i, carry):
        r0 = pl.multiple_of(i * sub, sub)
        x = x_ref[pl.ds(r0, sub), :].astype(jnp.float32)            # (sub, C)
        # Two-pass LayerNorm statistics (avoids E[x^2]-mean^2 cancellation).
        mean = jnp.sum(x, axis=-1, keepdims=True) * inv_c
        xc = x - mean
        var = jnp.sum(xc * xc, axis=-1, keepdims=True) * inv_c
        x_hat = xc * lax.rsqrt(var + EPS)
        # MXU operands in bf16, accumulate in f32; elementwise stays f32.
        h = jnp.dot(x_hat.astype(jnp.bfloat16), w1,
                    preferred_element_type=jnp.float32) + b1        # (sub, H)
        g = _gelu_tanh(h)
        out = jnp.dot(g.astype(jnp.bfloat16), w2,
                      preferred_element_type=jnp.float32) + b2      # (sub, C)
        o_ref[pl.ds(r0, sub), :] = out.astype(o_ref.dtype)
        return carry

    lax.fori_loop(0, n_sub, body, 0, unroll=False)


@functools.partial(jax.jit, static_argnames=("row_tile", "sub_rows"))
def prenorm_pallas(x, gamma, beta, w1, b1, w2, b2, *, row_tile=4096, sub_rows=256):
    """y = FFN(LayerNorm(x));  x: (B, N, C), w1: (C, H), w2: (H, C)."""
    B, N, C = x.shape
    H = w1.shape[1]
    R = B * N

    # Fold LayerNorm affine into the first linear (outside the kernel).
    w1f = (gamma[:, None] * w1).astype(jnp.bfloat16)                    # (C, H)
    b1f = (beta.astype(jnp.float32) @ w1.astype(jnp.float32)
           + b1.astype(jnp.float32)).reshape(1, H)                      # (1, H)
    w2b = w2.astype(jnp.bfloat16)                                       # (H, C)
    b2f = b2.reshape(1, C).astype(jnp.float32)                          # (1, C)

    # Row tile: as large as reasonable (big DMAs) but capped at ~R/2 so the
    # single 'parallel' grid axis can shard across both v7x TensorCores.
    # No divisibility requirement on R: grid uses cdiv + boundary masking.
    tile = min(row_tile, _round_up(max(pl.cdiv(R, 2), 1), 8))
    sub = sub_rows if (tile >= sub_rows and tile % sub_rows == 0) else tile

    x2 = x.reshape(R, C)   # view-like reshape; no padded copy is materialized

    # Right-size the VMEM request: 2-deep in/out buffers + resident weights +
    # in-kernel f32 temporaries, with 2x headroom, capped below v7x's 64 MiB.
    itemsize = jnp.dtype(x.dtype).itemsize
    io_bytes = 4 * tile * C * itemsize                    # 2 in + 2 out buffers
    wt_bytes = 2 * (w1f.size + w2b.size) + 4 * (b1f.size + b2f.size)
    tmp_bytes = 6 * sub * H * 4                           # h, g, x_hat, ... f32
    vmem_limit = int(min(48 << 20,
                         max(16 << 20, 2 * (io_bytes + wt_bytes + tmp_bytes))))

    out = pl.pallas_call(
        functools.partial(_prenorm_ffn_kernel, sub=sub),
        out_shape=jax.ShapeDtypeStruct((R, C), x.dtype),
        grid_spec=pltpu.PrefetchScalarGridSpec(
            num_scalar_prefetch=0,
            grid=(pl.cdiv(R, tile),),
            in_specs=[
                pl.BlockSpec((tile, C), lambda i: (i, 0)),  # x rows
                pl.BlockSpec((C, H), lambda i: (0, 0)),     # folded W1 (resident)
                pl.BlockSpec((1, H), lambda i: (0, 0)),     # folded b1
                pl.BlockSpec((H, C), lambda i: (0, 0)),     # W2
                pl.BlockSpec((1, C), lambda i: (0, 0)),     # b2
            ],
            out_specs=pl.BlockSpec((tile, C), lambda i: (i, 0)),
        ),
        compiler_params=pltpu.CompilerParams(
            dimension_semantics=("parallel",),
            vmem_limit_bytes=vmem_limit,
        ),
    )(x2, w1f, b1f, w2b, b2f)

    return out.reshape(B, N, C)
    # TODO(synk): a lane-dense (R/4, 128) repack with block-diagonal W1 would
    # fill all 128 lanes for C=32; left unimplemented pending measurement.


def prenorm_reference(x, gamma, beta, w1, b1, w2, b2):
    """Unfused pure-JAX f32 reference: LayerNorm(affine) -> Linear -> GELU -> Linear."""
    xf = x.astype(jnp.float32)
    mean = jnp.mean(xf, axis=-1, keepdims=True)
    var = jnp.mean(jnp.square(xf - mean), axis=-1, keepdims=True)
    x_hat = (xf - mean) * lax.rsqrt(var + EPS)
    y = x_hat * gamma + beta
    h = y @ w1 + b1
    g = _gelu_tanh(h)
    return (g @ w2 + b2).astype(x.dtype)


if __name__ == "__main__":
    key = jax.random.PRNGKey(0)
    B, Hs, Ws, C = 2, 7, 9, 32          # dim = C = 32, tokens = H*W = 63
    N = Hs * Ws                          # deliberately NOT a multiple of the
    R = B * N                            # row tile -> exercises boundary masking
    HID = 4 * C                          # FFN hidden = 4*dim = 128 (lane-dense)

    k_x, k_w1, k_b1, k_w2, k_b2, k_g, k_b = jax.random.split(key, 7)
    x = jax.random.normal(k_x, (B, N, C), dtype=jnp.float32)

    # LayerNorm params (PyTorch init is ones/zeros; perturb deterministically
    # so the affine path is actually exercised).
    gamma = 1.0 + 0.1 * jax.random.normal(k_g, (C,), dtype=jnp.float32)
    beta = 0.1 * jax.random.normal(k_b, (C,), dtype=jnp.float32)

    # fn = Linear(C,4C) + GELU + Linear(4C,C), deterministic synthetic init.
    # TODO(synk): the real IGAB FeedForward also has a depthwise 3x3 conv
    # between the two 1x1 projections; `fn` is an injected module so only the
    # point-wise (token-local) path is instantiated here.
    w1 = 0.05 * jax.random.normal(k_w1, (C, HID), dtype=jnp.float32)
    b1 = 0.05 * jax.random.normal(k_b1, (HID,), dtype=jnp.float32)
    w2 = 0.05 * jax.random.normal(k_w2, (HID, C), dtype=jnp.float32)
    b2 = 0.05 * jax.random.normal(k_b2, (C,), dtype=jnp.float32)

    out = prenorm_pallas(x, gamma, beta, w1, b1, w2, b2)
    out = jax.block_until_ready(out)

    ref = prenorm_reference(x, gamma, beta, w1, b1, w2, b2)
    assert out.shape == (B, N, C)
    # bf16 MXU operands vs f32 reference -> loosened tolerance.
    assert jnp.allclose(out, ref, atol=2e-2, rtol=2e-2), (
        "mismatch vs reference, max abs diff = %f"
        % float(jnp.max(jnp.abs(out - ref))))

    print("KERNEL_OK")
</pallas_src>

<mosaic_0001>
module attributes {stable_mosaic.version = 11 : i64} {
  func.func @_prenorm_ffn_kernel(%arg0: i32, %arg1: memref<64x32xf32, #tpu.memory_space<vmem>>, %arg2: memref<32x128xbf16, #tpu.memory_space<vmem>>, %arg3: memref<1x128xf32, #tpu.memory_space<vmem>>, %arg4: memref<128x32xbf16, #tpu.memory_space<vmem>>, %arg5: memref<1x32xf32, #tpu.memory_space<vmem>>, %arg6: memref<64x32xf32, #tpu.memory_space<vmem>>) attributes {dimension_semantics = [#tpu.dimension_semantics<parallel>], iteration_bounds = array<i64: 2>, scalar_prefetch = 0 : i64, scratch_operands = 0 : i64, tpu.core_type = #tpu.core_type<tc>, window_params = [{transform_indices = @transform_0, window_bounds = array<i64: 64, 32>}, {pipeline_mode = #tpu.pipeline_mode<synchronous>, transform_indices = @transform_1, window_bounds = array<i64: 32, 128>}, {pipeline_mode = #tpu.pipeline_mode<synchronous>, transform_indices = @transform_2, window_bounds = array<i64: 1, 128>}, {pipeline_mode = #tpu.pipeline_mode<synchronous>, transform_indices = @transform_3, window_bounds = array<i64: 128, 32>}, {pipeline_mode = #tpu.pipeline_mode<synchronous>, transform_indices = @transform_4, window_bounds = array<i64: 1, 32>}, {transform_indices = @transform_5, window_bounds = array<i64: 64, 32>}]} {
    %c0 = arith.constant 0 : index
    %c0_0 = arith.constant 0 : index
    %0 = vector.load %arg2[%c0, %c0_0] : memref<32x128xbf16, #tpu.memory_space<vmem>>, vector<32x128xbf16>
    %c0_1 = arith.constant 0 : index
    %c0_2 = arith.constant 0 : index
    %1 = vector.load %arg3[%c0_1, %c0_2] : memref<1x128xf32, #tpu.memory_space<vmem>>, vector<1x128xf32>
    %c0_3 = arith.constant 0 : index
    %c0_4 = arith.constant 0 : index
    %2 = vector.load %arg4[%c0_3, %c0_4] : memref<128x32xbf16, #tpu.memory_space<vmem>>, vector<128x32xbf16>
    %c0_5 = arith.constant 0 : index
    %c0_6 = arith.constant 0 : index
    %3 = vector.load %arg5[%c0_5, %c0_6] : memref<1x32xf32, #tpu.memory_space<vmem>>, vector<1x32xf32>
    %c0_i32 = arith.constant 0 : i32
    %c64_i32 = arith.constant 64 : i32
    %4 = arith.muli %c0_i32, %c64_i32 : i32
    %5 = tpu.assume_multiple %4, 64 : i32
    %6 = arith.index_cast %5 : i32 to index
    %c0_7 = arith.constant 0 : index
    %7 = vector.load %arg1[%6, %c0_7] : memref<64x32xf32, #tpu.memory_space<vmem>>, vector<64x32xf32>
    %cst = arith.constant dense<0.000000e+00> : vector<64xf32>
    %8 = vector.multi_reduction <add>, %7, %cst [1] : vector<64x32xf32> to vector<64xf32>
    %9 = vector.shape_cast %8 : vector<64xf32> to vector<64x1xf32>
    %cst_8 = arith.constant 3.125000e-02 : f32
    %10 = vector.broadcast %cst_8 : f32 to vector<64x1xf32>
    %11 = arith.mulf %9, %10 : vector<64x1xf32>
    %12 = vector.broadcast %11 : vector<64x1xf32> to vector<64x32xf32>
    %13 = arith.subf %7, %12 : vector<64x32xf32>
    %14 = arith.mulf %13, %13 : vector<64x32xf32>
    %cst_9 = arith.constant dense<0.000000e+00> : vector<64xf32>
    %15 = vector.multi_reduction <add>, %14, %cst_9 [1] : vector<64x32xf32> to vector<64xf32>
    %16 = vector.shape_cast %15 : vector<64xf32> to vector<64x1xf32>
    %cst_10 = arith.constant 3.125000e-02 : f32
    %17 = vector.broadcast %cst_10 : f32 to vector<64x1xf32>
    %18 = arith.mulf %16, %17 : vector<64x1xf32>
    %cst_11 = arith.constant 9.99999974E-6 : f32
    %19 = vector.broadcast %cst_11 : f32 to vector<64x1xf32>
    %20 = arith.addf %18, %19 : vector<64x1xf32>
    %21 = math.rsqrt %20 : vector<64x1xf32>
    %22 = vector.broadcast %21 : vector<64x1xf32> to vector<64x32xf32>
    %23 = arith.mulf %13, %22 : vector<64x32xf32>
    %24 = arith.truncf %23 : vector<64x32xf32> to vector<64x32xbf16>
    %cst_12 = arith.constant dense<0.000000e+00> : vector<64x128xf32>
    %25 = tpu.matmul %24, %0, %cst_12 {dimension_numbers = #tpu.dot_dimension_numbers<[1], [0], [0], [1], [0, 0, 1, 1], [], []>} : vector<64x32xbf16>, vector<32x128xbf16>, vector<64x128xf32> -> vector<64x128xf32>
    %26 = vector.broadcast %1 : vector<1x128xf32> to vector<64x128xf32>
    %27 = arith.addf %25, %26 : vector<64x128xf32>
    %cst_13 = arith.constant 5.000000e-01 : f32
    %28 = vector.broadcast %cst_13 : f32 to vector<64x128xf32>
    %29 = arith.mulf %28, %27 : vector<64x128xf32>
    %cst_14 = arith.constant 4.471500e-02 : f32
    %30 = vector.broadcast %cst_14 : f32 to vector<64x128xf32>
    %31 = arith.mulf %30, %27 : vector<64x128xf32>
    %32 = arith.mulf %31, %27 : vector<64x128xf32>
    %33 = arith.mulf %32, %27 : vector<64x128xf32>
    %34 = arith.addf %27, %33 : vector<64x128xf32>
    %cst_15 = arith.constant 0.797884583 : f32
    %35 = vector.broadcast %cst_15 : f32 to vector<64x128xf32>
    %36 = arith.mulf %35, %34 : vector<64x128xf32>
    %37 = math.tanh %36 : vector<64x128xf32>
    %cst_16 = arith.constant 1.000000e+00 : f32
    %38 = vector.broadcast %cst_16 : f32 to vector<64x128xf32>
    %39 = arith.addf %38, %37 : vector<64x128xf32>
    %40 = arith.mulf %29, %39 : vector<64x128xf32>
    %41 = arith.truncf %40 : vector<64x128xf32> to vector<64x128xbf16>
    %cst_17 = arith.constant dense<0.000000e+00> : vector<64x32xf32>
    %42 = tpu.matmul %41, %2, %cst_17 {dimension_numbers = #tpu.dot_dimension_numbers<[1], [0], [0], [1], [0, 0, 1, 1], [], []>} : vector<64x128xbf16>, vector<128x32xbf16>, vector<64x32xf32> -> vector<64x32xf32>
    %43 = vector.broadcast %3 : vector<1x32xf32> to vector<64x32xf32>
    %44 = arith.addf %42, %43 : vector<64x32xf32>
    %45 = arith.index_cast %5 : i32 to index
    %c0_18 = arith.constant 0 : index
    %46 = vector.load %arg6[%45, %c0_18] : memref<64x32xf32, #tpu.memory_space<vmem>>, vector<64x32xf32>
    tpu.vector_store %arg6[%45, %c0_18], %44 {strides = array<i32>} : memref<64x32xf32, #tpu.memory_space<vmem>>, vector<64x32xf32>,
    %c1_i32 = arith.constant 1 : i32
    return
  }
  func.func @transform_0(%arg0: i32) -> (i32, i32) {
    %c0_i32 = arith.constant 0 : i32
    %c0_i32_0 = arith.constant 0 : i32
    return %arg0, %c0_i32 : i32, i32
  }
  func.func @transform_1(%arg0: i32) -> (i32, i32) {
    %c0_i32 = arith.constant 0 : i32
    %c0_i32_0 = arith.constant 0 : i32
    %c0_i32_1 = arith.constant 0 : i32
    return %c0_i32, %c0_i32_0 : i32, i32
  }
  func.func @transform_2(%arg0: i32) -> (i32, i32) {
    %c0_i32 = arith.constant 0 : i32
    %c0_i32_0 = arith.constant 0 : i32
    %c0_i32_1 = arith.constant 0 : i32
    return %c0_i32, %c0_i32_0 : i32, i32
  }
  func.func @transform_3(%arg0: i32) -> (i32, i32) {
    %c0_i32 = arith.constant 0 : i32
    %c0_i32_0 = arith.constant 0 : i32
    %c0_i32_1 = arith.constant 0 : i32
    return %c0_i32, %c0_i32_0 : i32, i32
  }
  func.func @transform_4(%arg0: i32) -> (i32, i32) {
    %c0_i32 = arith.constant 0 : i32
    %c0_i32_0 = arith.constant 0 : i32
    %c0_i32_1 = arith.constant 0 : i32
    return %c0_i32, %c0_i32_0 : i32, i32
  }
  func.func @transform_5(%arg0: i32) -> (i32, i32) {
    %c0_i32 = arith.constant 0 : i32
    %c0_i32_0 = arith.constant 0 : i32
    return %arg0, %c0_i32 : i32, i32
  }
}

</mosaic_0001>

<bundles_post_ra>
// kernel: prenorm_pallas.1
= control target key start
LH: loop header
LB: loop body
LE: loop exit
PB: predicated region body
PF: predicated region fallthrough
CT: control target
= control target key end

     0   :  { %s891_s18 = smov 0   ;;  %s1061_s0 = inlined_call_operand.vmem [shape: f32[126,32], index: 0, kind: input, shape index: {}]   ;;  %s1062_s1 = inlined_call_operand.vmem [shape: bf16[32,128], index: 1, kind: input, shape index: {}]   ;;  %s1063_s2 = inlined_call_operand.vmem [shape: f32[1,128], index: 2, kind: input, shape index: {}]   ;;  %s1064_s3 = inlined_call_operand.vmem [shape: bf16[128,32], index: 3, kind: input, shape index: {}]   ;;  %s1065_s4 = inlined_call_operand.vmem [shape: f32[1,32], index: 4, kind: input, shape index: {}]   ;;  %s1066_s5 = inlined_call_operand.vmem [shape: f32[126,32], index: 5, kind: output, shape index: {}]  }
   0x1 LB: > { %s722_s19 = sadd.s32 4294967295, %s859_s18   ;;  %p726_p0 = scmp.ge.s32.totalorder %s859_s18, 1  ;;  %s859_s18 = sphi %s891_s18, %s15_s18  }
   0x2   : > { %p188_p1 = scmp.lt.s32.totalorder %s859_s18, 3 }
   0x4   : > { %p189_p2 = pnand %p726_p0, %p188_p1 }
   0x5   : > { %s727_s20 = sshll.u32 (!%p189_p2), %s722_s19, 3  ;;  %vm259_vm0 = vcmask (!%p189_p2), 261120   ;;  %v811_v56 = vld [vmem:[%s1062_s1] sm:$0xff] (!%p189_p2)   ;;  %v812_v57 = vld [vmem:[%s1062_s1 + $0x8] sm:$0xff] (!%p189_p2)  }
   0x6   : > { %192 = sbr.rel (%p189_p2) target bundleno = 807 (0x327), region = 40  ;;  %p217_p3 = scmp.lt.s32.totalorder (!%p189_p2), %s727_s20, 15  ;;  %767 = vmatprep.subr.bf16.mxu0 (!%p189_p2), %v811_v56 }
   0x7   : > { %768 = vmatpush3.bf16.msra.mxu0 (!%p189_p2), %v811_v56 }
   0x8   : > { %769 = vmatprep.subr.bf16.mxu0 (!%p189_p2), %v812_v57 }
   0xb   : > { %770 = vmatpush3.bf16.msra.mxu0 (!%p189_p2), %v812_v57 }
   0xd   : > { %s1068_s20 = smov (!%p217_p3, %s727_s20), 15 }
   0xe   : > { %s728_s21 = sshll.u32 %s1068_s20, 3 }
   0xf   : > { %s220_s24 = scalar_lea.vmem %s1061_s0, %s728_s21  ;;  %s226_s29 = scalar_lea.vmem %s1066_s5, %s728_s21 }
  0x10   : > { %v251_v0 = vld [vmem:[%s220_s24] sm:$0xff]  ;;  %v253_v1 = vld [vmem:[%s220_s24 + $0x10] sm:$0xff]  ;;  %v252_v2 = vld [vmem:[%s220_s24 + $0x8] sm:$0xff] }
  0x11   : > { %v260_v3 = vsel %vm259_vm0, %v251_v0, 0.0  ;;  %v266_v4 = vsel %vm259_vm0, %v253_v1, 0.0  ;;  %v254_v5 = vld [vmem:[%s220_s24 + $0x18] sm:$0xff]  ;;  %v263_v6 = vsel %vm259_vm0, %v252_v2, 0.0  ;;  %v255_v8 = vld [vmem:[%s220_s24 + $0x20] sm:$0xff]  ;;  %v256_v9 = vld [vmem:[%s220_s24 + $0x28] sm:$0xff] }
  0x12   : > { %261 = vadd.xlane.f32.xlu0 %v260_v3  ;;  %267 = vadd.xlane.f32.xlu1 %v266_v4  ;;  %v269_v7 = vsel %vm259_vm0, %v254_v5, 0.0  ;;  %v272_v10 = vsel %vm259_vm0, %v255_v8, 0.0  ;;  %v275_v11 = vsel %vm259_vm0, %v256_v9, 0.0  ;;  %v257_v12 = vld [vmem:[%s220_s24 + $0x30] sm:$0xff]  ;;  %v258_v13 = vld [vmem:[%s220_s24 + $0x38] sm:$0xff] }
  0x13   : > { %v278_v14 = vsel %vm259_vm0, %v257_v12, 0.0  ;;  %v281_v15 = vsel %vm259_vm0, %v258_v13, 0.0 }
  0x16   : > { %264 = vadd.xlane.f32.xlu0 %v263_v6  ;;  %270 = vadd.xlane.f32.xlu1 %v269_v7 }
  0x1a   : > { %273 = vadd.xlane.f32.xlu0 %v272_v10  ;;  %276 = vadd.xlane.f32.xlu1 %v275_v11 }
  0x1e   : > { %279 = vadd.xlane.f32.xlu0 %v278_v14  ;;  %282 = vadd.xlane.f32.xlu1 %v281_v15 }
  0x9f   : > { %v262_v16 = vpop.xlane.xlu0 %261  ;;  %v268_v17 = vpop.xlane.xlu1 %267 }
  0xa0   : > { %v284_v18 = vmul.f32 0.03125, %v262_v16  ;;  %v286_v19 = vmul.f32 0.03125, %v268_v17 }
  0xa2   : > { %v915_v20 = vsub.f32 %v251_v0, %v284_v18  ;;  %v917_v21 = vsub.f32 %v253_v1, %v286_v19 }
  0xa3   : > { %v265_v22 = vpop.xlane.xlu0 %264  ;;  %v271_v23 = vpop.xlane.xlu1 %270 }
  0xa4   : > { %v285_v24 = vmul.f32 0.03125, %v265_v22  ;;  %v287_v25 = vmul.f32 0.03125, %v271_v23  ;;  %v300_v26 = vmul.f32 %v915_v20, %v915_v20  ;;  %v302_v27 = vmul.f32 %v917_v21, %v917_v21 }
  0xa6   : > { %v923_v28 = vsub.f32 %v252_v2, %v285_v24  ;;  %v925_v29 = vsub.f32 %v254_v5, %v287_v25  ;;  %v308_v30 = vsel %vm259_vm0, %v300_v26, 0.0  ;;  %v314_v33 = vsel %vm259_vm0, %v302_v27, 0.0 }
  0xa7   : > { %309 = vadd.xlane.f32.xlu0 %v308_v30  ;;  %v274_v31 = vpop.xlane.xlu0 %273  ;;  %v277_v32 = vpop.xlane.xlu1 %276 }
  0xa8   : > { %v288_v34 = vmul.f32 0.03125, %v274_v31  ;;  %v289_v35 = vmul.f32 0.03125, %v277_v32  ;;  %v301_v36 = vmul.f32 %v923_v28, %v923_v28  ;;  %v303_v37 = vmul.f32 %v925_v29, %v925_v29 }
  0xaa   : > { %v933_v38 = vsub.f32 %v255_v8, %v288_v34  ;;  %v935_v39 = vsub.f32 %v256_v9, %v289_v35  ;;  %v311_v40 = vsel %vm259_vm0, %v301_v36, 0.0  ;;  %v317_v43 = vsel %vm259_vm0, %v303_v37, 0.0 }
  0xab   : > { %315 = vadd.xlane.f32.xlu0 %v314_v33  ;;  %312 = vadd.xlane.f32.xlu1 %v311_v40  ;;  %v280_v41 = vpop.xlane.xlu0 %279  ;;  %v283_v42 = vpop.xlane.xlu1 %282 }
  0xac   : > { %v290_v44 = vmul.f32 0.03125, %v280_v41  ;;  %v291_v45 = vmul.f32 0.03125, %v283_v42  ;;  %v304_v46 = vmul.f32 %v933_v38, %v933_v38  ;;  %v305_v47 = vmul.f32 %v935_v39, %v935_v39  ;;  %v816_v41 = vld [vmem:[%s1064_s3 + $0x18] sm:$0xff]   ;;  %v817_v42 = vld [vmem:[%s1064_s3 + $0x20] sm:$0xff]  }
  0xae   : > { %v943_v48 = vsub.f32 %v257_v12, %v290_v44  ;;  %v945_v49 = vsub.f32 %v258_v13, %v291_v45  ;;  %v320_v50 = vsel %vm259_vm0, %v304_v46, 0.0  ;;  %v323_v51 = vsel %vm259_vm0, %v305_v47, 0.0  ;;  %v819_v44 = vld [vmem:[%s1064_s3 + $0x30] sm:$0xff]   ;;  %v820_v45 = vld [vmem:[%s1064_s3 + $0x38] sm:$0xff]   ;;  %v731_v46 = vld [vmem:[%s1063_s2] ss:$0 sm:$0xff] }
  0xaf   : > { %318 = vadd.xlane.f32.xlu1 %v317_v43  ;;  %321 = vadd.xlane.f32.xlu0 %v320_v50  ;;  %v818_v43 = vld [vmem:[%s1064_s3 + $0x28] sm:$0xff]  }
  0xb0   : > { %v306_v52 = vmul.f32 %v943_v48, %v943_v48  ;;  %v307_v53 = vmul.f32 %v945_v49, %v945_v49 }
  0xb2   : > { %v326_v54 = vsel %vm259_vm0, %v306_v52, 0.0  ;;  %v329_v55 = vsel %vm259_vm0, %v307_v53, 0.0 }
  0xb3   : > { %324 = vadd.xlane.f32.xlu1 %v323_v51  ;;  %327 = vadd.xlane.f32.xlu0 %v326_v54 }
  0xb7   : > { %330 = vadd.xlane.f32.xlu1 %v329_v55 }
 0x134   : > { %v310_v58 = vpop.xlane.xlu0 %309 }
 0x135   : > { %v332_v59 = vmul.f32 0.03125, %v310_v58 }
 0x137   : > { %v340_v60 = vadd.f32 1e-05, %v332_v59 }
 0x138   : > { %v313_v61 = vpop.xlane.xlu1 %312  ;;  %v316_v62 = vpop.xlane.xlu0 %315 }
 0x139   : > { %v333_v63 = vmul.f32 0.03125, %v313_v61  ;;  %v334_v0 = vmul.f32 0.03125, %v316_v62  ;;  %821 = vrsqrt.f32 %v340_v60 }
 0x13b   : > { %v341_v1 = vadd.f32 1e-05, %v333_v63  ;;  %v342_v2 = vadd.f32 1e-05, %v334_v0 }
 0x13c   : > { %v319_v3 = vpop.xlane.xlu1 %318  ;;  %v322_v4 = vpop.xlane.xlu0 %321 }
 0x13d   : > { %823 = vrsqrt.f32 %v341_v1  ;;  %v335_v5 = vmul.f32 0.03125, %v319_v3  ;;  %v336_v6 = vmul.f32 0.03125, %v322_v4 }
 0x13e   : > { %825 = vrsqrt.f32 %v342_v2 }
 0x13f   : > { %v343_v7 = vadd.f32 1e-05, %v335_v5  ;;  %v344_v8 = vadd.f32 1e-05, %v336_v6 }
 0x140   : > { %v325_v9 = vpop.xlane.xlu1 %324  ;;  %v328_v10 = vpop.xlane.xlu0 %327 }
 0x141   : > { %827 = vrsqrt.f32 %v343_v7  ;;  %v337_v11 = vmul.f32 0.03125, %v325_v9  ;;  %v338_v12 = vmul.f32 0.03125, %v328_v10 }
 0x142   : > { %829 = vrsqrt.f32 %v344_v8 }
 0x143   : > { %v345_v13 = vadd.f32 1e-05, %v337_v11  ;;  %v346_v14 = vadd.f32 1e-05, %v338_v12  ;;  %v822_v16 = vpop.eup %821 }
 0x144   : > { %v331_v15 = vpop.xlane.xlu1 %330  ;;  %v356_v22 = vmul.f32 %v822_v16, %v915_v20 }
 0x145   : > { %831 = vrsqrt.f32 %v345_v13  ;;  %v339_v17 = vmul.f32 0.03125, %v331_v15 }
 0x146   : > { %833 = vrsqrt.f32 %v346_v14 }
 0x147   : > { %v824_v18 = vpop.eup %823  ;;  %v347_v19 = vadd.f32 1e-05, %v339_v17 }
 0x148   : > { %v357_v23 = vmul.f32 %v824_v18, %v923_v28  ;;  %v826_v24 = vpop.eup %825 }
 0x149   : > { %835 = vrsqrt.f32 %v347_v19  ;;  %v358_v27 = vmul.f32 %v826_v24, %v917_v21 }
 0x14a   : > { %v364_v25 = vpack.c.bf16 %v357_v23, %v356_v22 }
 0x14b   : > { %v828_v26 = vpop.eup %827 }
 0x14c   : > { %771 = vmatprep.mubr.msk.bf16.mxu0 %vm259_vm0, %v364_v25  ;;  %v359_v30 = vmul.f32 %v828_v26, %v925_v29  ;;  %v830_v31 = vpop.eup %829  ;;  %v813_v29 = vld [vmem:[%s1064_s3] sm:$0xff]  }
 0x14d   : > { %v360_v34 = vmul.f32 %v830_v31, %v933_v38  ;;  %779 = vmatprep.subr.bf16.mxu1 %v813_v29  ;;  %v814_v38 = vld [vmem:[%s1064_s3 + $0x8] sm:$0xff]  }
 0x14e   : > { %v365_v32 = vpack.c.bf16 %v359_v30, %v358_v27  ;;  %780 = vmatpush3.bf16.msra.mxu1 %v813_v29 }
 0x14f   : > { %v832_v33 = vpop.eup %831  ;;  %781 = vmatprep.subr.bf16.mxu1 %v814_v38 }
 0x150   : > { %772 = vmatmul.mubr.msk.bf16.vlgmr.msra.gmra.mrb[0].mxu0 %vm259_vm0, %v365_v32  ;;  %v361_v20 = vmul.f32 %v832_v33, %v935_v39  ;;  %v834_v28 = vpop.eup %833  ;;  %v815_v39 = vld [vmem:[%s1064_s3 + $0x10] sm:$0xff]  }
 0x151   : > { %v362_v37 = vmul.f32 %v834_v28, %v943_v48 }
 0x152   : > { %v366_v35 = vpack.c.bf16 %v361_v20, %v360_v34  ;;  %782 = vmatpush3.bf16.msra.mxu1 %v814_v38 }
 0x153   : > { %v836_v36 = vpop.eup %835  ;;  %783 = vmatprep.subr.bf16.mxu1 %v815_v39 }
 0x154   : > { %775 = vmatprep.mubr.msk.bf16.mxu0 %vm259_vm0, %v366_v35  ;;  %v363_v21 = vmul.f32 %v836_v36, %v945_v49 }
 0x156   : > { %v367_v40 = vpack.c.bf16 %v363_v21, %v362_v37  ;;  %784 = vmatpush3.bf16.msra.mxu1 %v815_v39 }
 0x157   : > { %785 = vmatprep.subr.bf16.mxu1 %v816_v41 }
 0x158   : > { %776 = vmatmul.mubr.msk.bf16.gmra.mrb[4].mxu0 %vm259_vm0, %v367_v40 }
 0x15a   : > { %786 = vmatpush3.bf16.msra.mxu1 %v816_v41 }
 0x15b   : > { %787 = vmatprep.subr.bf16.mxu1 %v817_v42 }
 0x15e   : > { %788 = vmatpush3.bf16.msra.mxu1 %v817_v42 }
 0x15f   : > { %789 = vmatprep.subr.bf16.mxu1 %v818_v43 }
 0x162   : > { %790 = vmatpush3.bf16.msra.mxu1 %v818_v43 }
 0x163   : > { %791 = vmatprep.subr.bf16.mxu1 %v819_v44 }
 0x166   : > { %792 = vmatpush3.bf16.msra.mxu1 %v819_v44 }
 0x167   : > { %793 = vmatprep.subr.bf16.mxu1 %v820_v45 }
 0x16a   : > { %794 = vmatpush3.bf16.msra.mxu1 %v820_v45 }
 0x223   : > { %v773_v47 = vpop.f32.mrb[0].mxu0 }
 0x224   : > { %v1000_v48 = vadd.f32 %v773_v47, %v731_v46  ;;  %v432_v49 = vpop.f32.mrb[1].mxu0 }
 0x225   : > { %v1002_v50 = vadd.f32 %v731_v46, %v432_v49  ;;  %v774_v51 = vpop.f32.mrb[2].mxu0 }
 0x226   : > { %v473_v52 = vmul.f32 0.044715, %v1000_v48  ;;  %v1005_v53 = vadd.f32 %v774_v51, %v731_v46  ;;  %v435_v54 = vpop.f32.mrb[3].mxu0  ;;  %v465_v45 = vmul.f32 0.5, %v1000_v48 }
 0x227   : > { %v471_v55 = vmul.f32 0.044715, %v1002_v50  ;;  %v1008_v56 = vadd.f32 %v731_v46, %v435_v54  ;;  %v463_v49 = vmul.f32 0.5, %v1002_v50 }
 0x228   : > { %v481_v57 = vmul.f32 %v473_v52, %v1000_v48  ;;  %v474_v58 = vmul.f32 0.044715, %v1005_v53 }
 0x229   : > { %v472_v59 = vmul.f32 0.044715, %v1008_v56  ;;  %v479_v60 = vmul.f32 %v471_v55, %v1002_v50  ;;  %v464_v51 = vmul.f32 0.5, %v1008_v56 }
 0x22a   : > { %v489_v61 = vmul.f32 %v481_v57, %v1000_v48  ;;  %v482_v62 = vmul.f32 %v474_v58, %v1005_v53 }
 0x22b   : > { %v777_v63 = vpop.f32.mrb[4].mxu0  ;;  %v480_v0 = vmul.f32 %v472_v59, %v1008_v56  ;;  %v487_v1 = vmul.f32 %v479_v60, %v1002_v50 }
 0x22c   : > { %v490_v2 = vmul.f32 %v482_v62, %v1005_v53  ;;  %v1019_v3 = vadd.f32 %v777_v63, %v731_v46  ;;  %v448_v4 = vpop.f32.mrb[5].mxu0  ;;  %v497_v5 = vadd.f32 %v489_v61, %v1000_v48 }
 0x22d   : > { %v1022_v6 = vadd.f32 %v731_v46, %v448_v4  ;;  %v778_v7 = vpop.f32.mrb[6].mxu0  ;;  %v488_v8 = vmul.f32 %v480_v0, %v1008_v56  ;;  %v495_v9 = vadd.f32 %v487_v1, %v1002_v50 }
 0x22e   : > { %v477_v10 = vmul.f32 0.044715, %v1019_v3  ;;  %v460_v11 = vadd.f32 %v778_v7, %v731_v46  ;;  %v451_v12 = vpop.f32.mrb[7].mxu0  ;;  %v498_v13 = vadd.f32 %v490_v2, %v1005_v53  ;;  %v505_v14 = vmul.f32 0.7978846, %v497_v5 }
 0x22f   : > { %v475_v15 = vmul.f32 0.044715, %v1022_v6  ;;  %v452_v16 = vadd.f32 %v731_v46, %v451_v12  ;;  %v496_v17 = vadd.f32 %v488_v8, %v1008_v56  ;;  %v503_v18 = vmul.f32 0.7978846, %v495_v9 }
 0x230   : > { %v485_v19 = vmul.f32 %v477_v10, %v1019_v3  ;;  %v478_v22 = vmul.f32 0.044715, %v460_v11  ;;  %v506_v23 = vmul.f32 0.7978846, %v498_v13  ;;  %837 = vtanh.f32 %v505_v14  ;;  %v738_v14 = vld [vmem:[%s1065_s4] ss:$0 sm:$0xff] }
 0x231   : > { %v483_v24 = vmul.f32 %v475_v15, %v1022_v6  ;;  %v476_v25 = vmul.f32 0.044715, %v452_v16  ;;  %v504_v26 = vmul.f32 0.7978846, %v496_v17  ;;  %839 = vtanh.f32 %v503_v18 }
 0x232   : > { %v493_v27 = vmul.f32 %v485_v19, %v1019_v3  ;;  %v486_v30 = vmul.f32 %v478_v22, %v460_v11  ;;  %841 = vtanh.f32 %v506_v23  ;;  %v466_v46 = vmul.f32 0.5, %v1005_v53 }
 0x233   : > { %v491_v31 = vmul.f32 %v483_v24, %v1022_v6  ;;  %v484_v32 = vmul.f32 %v476_v25, %v452_v16  ;;  %843 = vtanh.f32 %v504_v26  ;;  %v469_v50 = vmul.f32 0.5, %v1019_v3 }
 0x234   : > { %v494_v33 = vmul.f32 %v486_v30, %v460_v11  ;;  %v501_v34 = vadd.f32 %v493_v27, %v1019_v3  ;;  %v470_v53 = vmul.f32 0.5, %v460_v11  ;;  %v467_v2 = vmul.f32 0.5, %v1022_v6 }
 0x235   : > { %v492_v20 = vmul.f32 %v484_v32, %v452_v16  ;;  %v499_v28 = vadd.f32 %v491_v31, %v1022_v6  ;;  %v468_v4 = vmul.f32 0.5, %v452_v16 }
 0x236   : > { %v502_v35 = vadd.f32 %v494_v33, %v460_v11  ;;  %v509_v36 = vmul.f32 0.7978846, %v501_v34 }
 0x237   : > { %v500_v37 = vadd.f32 %v492_v20, %v452_v16  ;;  %v507_v21 = vmul.f32 0.7978846, %v499_v28 }
 0x238   : > { %v510_v40 = vmul.f32 0.7978846, %v502_v35  ;;  %845 = vtanh.f32 %v509_v36 }
 0x239   : > { %v508_v29 = vmul.f32 0.7978846, %v500_v37  ;;  %847 = vtanh.f32 %v507_v21 }
 0x23a   : > { %v838_v38 = vpop.eup %837  ;;  %849 = vtanh.f32 %v510_v40 }
 0x23b   : > { %v840_v39 = vpop.eup %839  ;;  %v521_v41 = vadd.f32 1.0, %v838_v38  ;;  %851 = vtanh.f32 %v508_v29 }
 0x23c   : > { %v842_v42 = vpop.eup %841  ;;  %v519_v43 = vadd.f32 1.0, %v840_v39 }
 0x23d   : > { %v844_v44 = vpop.eup %843  ;;  %v522_v47 = vadd.f32 1.0, %v842_v42  ;;  %v529_v54 = vmul.f32 %v521_v41, %v465_v45 }
 0x23e   : > { %v520_v52 = vadd.f32 1.0, %v844_v44  ;;  %v527_v57 = vmul.f32 %v519_v43, %v463_v49 }
 0x23f   : > { %v530_v55 = vmul.f32 %v522_v47, %v466_v46 }
 0x240   : > { %v528_v58 = vmul.f32 %v520_v52, %v464_v51 }
 0x241   : > { %v536_v59 = vpack.c.bf16 %v530_v55, %v529_v54 }
 0x242   : > { %v846_v60 = vpop.eup %845  ;;  %v535_v61 = vpack.c.bf16 %v528_v58, %v527_v57 }
 0x243   : > { %v848_v62 = vpop.eup %847  ;;  %v525_v63 = vadd.f32 1.0, %v846_v60 }
 0x244   : > { %v850_v0 = vpop.eup %849  ;;  %795 = vmatprep.mubr.bf16.mxu1 %v535_v61  ;;  %v523_v48 = vadd.f32 1.0, %v848_v62 }
 0x245   : > { %v852_v1 = vpop.eup %851  ;;  %796 = vmatmul.mubr.bf16.vlgmr.msra.gmra.mrb[0].mxu1 %v536_v59  ;;  %v526_v56 = vadd.f32 1.0, %v850_v0  ;;  %v533_v7 = vmul.f32 %v525_v63, %v469_v50 }
 0x246   : > { %v524_v5 = vadd.f32 1.0, %v852_v1  ;;  %v531_v9 = vmul.f32 %v523_v48, %v467_v2 }
 0x247   : > { %v534_v8 = vmul.f32 %v526_v56, %v470_v53 }
 0x248   : > { %v532_v10 = vmul.f32 %v524_v5, %v468_v4 }
 0x249   : > { %v538_v12 = vpack.c.bf16 %v534_v8, %v533_v7 }
 0x24a   : > { %v537_v13 = vpack.c.bf16 %v532_v10, %v531_v9 }
 0x24c   : > { %799 = vmatprep.mubr.bf16.mxu1 %v537_v13 }
 0x24d   : > { %800 = vmatmul.mubr.bf16.gmra.mrb[4].mxu1 %v538_v12 }
 0x318   : > { %v797_v3 = vpop.f32.mrb[0].mxu1 }
 0x319   : > { %v636_v6 = vadd.f32 %v797_v3, %v738_v14  ;;  %v627_v11 = vpop.f32.mrb[1].mxu1 }
 0x31a   : > { %v628_v15 = vadd.f32 %v738_v14, %v627_v11  ;;  %v798_v16 = vpop.f32.mrb[2].mxu1 }
 0x31b   : > { %660 = vst.msk [vmem:[%s226_s29 + $0x10] sm:$0xff] %vm259_vm0, %v636_v6  ;;  %v639_v17 = vadd.f32 %v798_v16, %v738_v14  ;;  %v630_v18 = vpop.f32.mrb[3].mxu1 }
 0x31c   : > { %658 = vst.msk [vmem:[%s226_s29] sm:$0xff] %vm259_vm0, %v628_v15  ;;  %v631_v19 = vadd.f32 %v738_v14, %v630_v18 }
 0x31d   : > { %661 = vst.msk [vmem:[%s226_s29 + $0x18] sm:$0xff] %vm259_vm0, %v639_v17 }
 0x31e   : > { %659 = vst.msk [vmem:[%s226_s29 + $0x8] sm:$0xff] %vm259_vm0, %v631_v19 }
 0x320   : > { %v801_v22 = vpop.f32.mrb[4].mxu1 }
 0x321   : > { %v652_v23 = vadd.f32 %v801_v22, %v738_v14  ;;  %v643_v24 = vpop.f32.mrb[5].mxu1 }
 0x322   : > { %v644_v25 = vadd.f32 %v738_v14, %v643_v24  ;;  %v802_v26 = vpop.f32.mrb[6].mxu1 }
 0x323   : > { %664 = vst.msk [vmem:[%s226_s29 + $0x30] sm:$0xff] %vm259_vm0, %v652_v23  ;;  %v655_v27 = vadd.f32 %v802_v26, %v738_v14  ;;  %v646_v30 = vpop.f32.mrb[7].mxu1 }
 0x324   : > { %662 = vst.msk [vmem:[%s226_s29 + $0x20] sm:$0xff] %vm259_vm0, %v644_v25  ;;  %v647_v31 = vadd.f32 %v738_v14, %v646_v30 }
 0x325   : > { %665 = vst.msk [vmem:[%s226_s29 + $0x38] sm:$0xff] %vm259_vm0, %v655_v27 }
 0x326   : > { %663 = vst.msk [vmem:[%s226_s29 + $0x28] sm:$0xff] %vm259_vm0, %v647_v31 }
 0x327 PF: > { %s15_s18 = sadd.s32 1, %s859_s18  }
 0x328   : > { %p12_p4 = scmp.ge.s32.totalorder %s15_s18, 4  }
 0x32a   :  { %14 = sbr.rel (!%p12_p4) target bundleno = 1 (0x1), region = 70 }

</bundles_post_ra>
